<compile_context>
chip_gen: v6e
topology: v6e:2x2x1
jax: 0.10.0
libtpu: 0.0.40
codegen_flags: <defaults>
</compile_context>

<pallas_src>
import jax
import jax.numpy as jnp
from jax.experimental import pallas as pl
from jax.experimental.pallas import tpu as pltpu


def _mlp_kernel(x_ref, w1_ref, b1_ref, w23_ref, b23_ref, o_ref):
    # Layer 1: Linear(D_in -> H1) + ReLU.  bf16 operands, f32 accumulation on
    # the MXU; bias add + ReLU in f32 on the VPU. (Dropout is identity in eval.)
    h1 = jnp.dot(x_ref[...], w1_ref[...], preferred_element_type=jnp.float32)
    h1 = jnp.maximum(h1 + b1_ref[...], 0.0)                 # (B, H1) f32

    # Folded layers 2+3: Linear(H1 -> 1).  N=1 matmul would waste the MXU, so
    # do a VPU multiply + lane reduce instead.  w23 is (1, H1) f32, b23 scalar
    # in SMEM.
    h3 = jnp.sum(h1 * w23_ref[...], axis=-1, keepdims=True) + b23_ref[0, 0]

    # Sigmoid on the EUP (f32), then store (B, 1).
    o_ref[...] = jax.nn.sigmoid(h3)


def torch_model_forward(x, w1, b1, w2, b2, w3, b3):
    """Fused forward pass of the wrapped model (eval mode).

    Folds layers 2 & 3 offline, casts MXU inputs to bf16, and runs a single
    un-gridded pallas_call (everything fits in VMEM at these sizes).  If B ever
    grows to many thousands of rows, reintroduce a batch-only grid with the
    weights kept VMEM-resident (index_map -> (0, 0)).
    """
    B, _ = x.shape
    D_out = w3.shape[1]
    assert D_out == 1, "folded VPU projection assumes a single output unit"

    # Offline algebraic fold of the two back-to-back linear layers (no
    # nonlinearity between them; Dropout is identity in eval).
    w23 = (w2 @ w3).reshape(1, -1).astype(jnp.float32)        # (1, H1), lane-dense
    b23 = (b2 @ w3 + b3).reshape(1, 1).astype(jnp.float32)    # (1, 1) scalar

    # bf16 MXU inputs (half the DMA bytes, 2x matmul rate); accumulate in f32.
    x_bf = x.astype(jnp.bfloat16)
    w1_bf = w1.astype(jnp.bfloat16)

    vmem = pl.BlockSpec(memory_space=pltpu.MemorySpace.VMEM)
    smem = pl.BlockSpec(memory_space=pltpu.MemorySpace.SMEM)

    return pl.pallas_call(
        _mlp_kernel,
        out_shape=jax.ShapeDtypeStruct((B, D_out), jnp.float32),
        in_specs=[vmem, vmem, vmem, vmem, smem],
        out_specs=vmem,
    )(x_bf, w1_bf, b1, w23, b23)


def init_params(key, d_in, h1, h2, d_out):
    """Deterministic parameter init (synthetic; no checkpoint loading)."""
    ks = jax.random.split(key, 6)
    w1 = jax.random.normal(ks[0], (d_in, h1), jnp.float32) * (1.0 / jnp.sqrt(d_in))
    b1 = jax.random.normal(ks[1], (1, h1), jnp.float32) * 0.01
    w2 = jax.random.normal(ks[2], (h1, h2), jnp.float32) * (1.0 / jnp.sqrt(h1))
    b2 = jax.random.normal(ks[3], (1, h2), jnp.float32) * 0.01
    w3 = jax.random.normal(ks[4], (h2, d_out), jnp.float32) * (1.0 / jnp.sqrt(h2))
    b3 = jax.random.normal(ks[5], (1, d_out), jnp.float32) * 0.01
    return w1, b1, w2, b2, w3, b3


def reference_forward(x, w1, b1, w2, b2, w3, b3):
    # Full-precision reference of the original (unfolded) module in eval mode.
    h1 = jnp.maximum(x @ w1 + b1, 0.0)
    h2 = h1 @ w2 + b2
    return jax.nn.sigmoid(h2 @ w3 + b3)


if __name__ == "__main__":
    # Small shapes consistent with the wrapped MLP usage.
    B, D_IN, H1, H2, D_OUT = 8, 128, 512, 32, 1

    key = jax.random.PRNGKey(0)
    k_x, k_p = jax.random.split(key)
    x = jax.random.normal(k_x, (B, D_IN), jnp.float32)
    params = init_params(k_p, D_IN, H1, H2, D_OUT)

    out = torch_model_forward(x, *params)
    out = jax.block_until_ready(out)

    ref = reference_forward(x, *params)
    assert out.shape == (B, D_OUT)
    # bf16 MXU inputs -> relax tolerance vs the f32 reference.
    assert jnp.allclose(out, ref, atol=2e-2, rtol=2e-2), "mismatch vs JAX reference"

    print("KERNEL_OK")
</pallas_src>

<mosaic_0001>
module attributes {stable_mosaic.version = 11 : i64} {
  func.func @_mlp_kernel(%arg0: memref<8x128xbf16, #tpu.memory_space<vmem>>, %arg1: memref<128x512xbf16, #tpu.memory_space<vmem>>, %arg2: memref<1x512xf32, #tpu.memory_space<vmem>>, %arg3: memref<1x512xf32, #tpu.memory_space<vmem>>, %arg4: memref<1x1xf32, #tpu.memory_space<smem>>, %arg5: memref<8x1xf32, #tpu.memory_space<vmem>>) attributes {dimension_semantics = [], scalar_prefetch = 0 : i64, scratch_operands = 0 : i64, tpu.core_type = #tpu.core_type<tc>} {
    %c0 = arith.constant 0 : index
    %c0_0 = arith.constant 0 : index
    %0 = vector.load %arg0[%c0, %c0_0] : memref<8x128xbf16, #tpu.memory_space<vmem>>, vector<8x128xbf16>
    %c0_1 = arith.constant 0 : index
    %c0_2 = arith.constant 0 : index
    %1 = vector.load %arg1[%c0_1, %c0_2] : memref<128x512xbf16, #tpu.memory_space<vmem>>, vector<128x512xbf16>
    %cst = arith.constant dense<0.000000e+00> : vector<8x512xf32>
    %2 = tpu.matmul %0, %1, %cst {dimension_numbers = #tpu.dot_dimension_numbers<[1], [0], [0], [1], [0, 0, 1, 1], [], []>} : vector<8x128xbf16>, vector<128x512xbf16>, vector<8x512xf32> -> vector<8x512xf32>
    %c0_3 = arith.constant 0 : index
    %c0_4 = arith.constant 0 : index
    %3 = vector.load %arg2[%c0_3, %c0_4] : memref<1x512xf32, #tpu.memory_space<vmem>>, vector<1x512xf32>
    %4 = vector.broadcast %3 : vector<1x512xf32> to vector<8x512xf32>
    %5 = arith.addf %2, %4 : vector<8x512xf32>
    %cst_5 = arith.constant 0.000000e+00 : f32
    %6 = vector.broadcast %cst_5 : f32 to vector<8x512xf32>
    %7 = arith.maximumf %5, %6 : vector<8x512xf32>
    %c0_6 = arith.constant 0 : index
    %c0_7 = arith.constant 0 : index
    %8 = vector.load %arg3[%c0_6, %c0_7] : memref<1x512xf32, #tpu.memory_space<vmem>>, vector<1x512xf32>
    %9 = vector.broadcast %8 : vector<1x512xf32> to vector<8x512xf32>
    %10 = arith.mulf %7, %9 : vector<8x512xf32>
    %cst_8 = arith.constant dense<0.000000e+00> : vector<8xf32>
    %11 = vector.multi_reduction <add>, %10, %cst_8 [1] : vector<8x512xf32> to vector<8xf32>
    %12 = vector.shape_cast %11 : vector<8xf32> to vector<8x1xf32>
    %c0_9 = arith.constant 0 : index
    %c0_10 = arith.constant 0 : index
    %13 = memref.load %arg4[%c0_9, %c0_10] : memref<1x1xf32, #tpu.memory_space<smem>>
    %14 = vector.broadcast %13 : f32 to vector<8x1xf32>
    %15 = arith.addf %12, %14 : vector<8x1xf32>
    %16 = arith.negf %15 : vector<8x1xf32>
    %17 = math.exp %16 : vector<8x1xf32>
    %cst_11 = arith.constant 1.000000e+00 : f32
    %18 = vector.broadcast %cst_11 : f32 to vector<8x1xf32>
    %19 = arith.addf %18, %17 : vector<8x1xf32>
    %20 = arith.divf %18, %19 : vector<8x1xf32>
    %c0_12 = arith.constant 0 : index
    %c0_13 = arith.constant 0 : index
    %21 = vector.load %arg5[%c0_12, %c0_13] : memref<8x1xf32, #tpu.memory_space<vmem>>, vector<8x1xf32>
    tpu.vector_store %arg5[%c0_12, %c0_13], %20 {strides = array<i32>} : memref<8x1xf32, #tpu.memory_space<vmem>>, vector<8x1xf32>,
    return
  }
}

</mosaic_0001>

<bundles_post_ra>
// kernel: tpu_custom_call.1
= control target key start
LH: loop header
LB: loop body
LE: loop exit
PB: predicated region body
PF: predicated region fallthrough
CT: control target
= control target key end

     0   :  { %11 = vsyncpa [#allocation4], 0  ;;  %s617_s0 = inlined_call_operand.hbm [shape: bf16[8,128], index: 0, kind: input, shape index: {}]   ;;  %s618_s1 = inlined_call_operand.hbm [shape: bf16[128,512], index: 1, kind: input, shape index: {}]   ;;  %s619_s2 = inlined_call_operand.vmem [shape: f32[1,512], index: 2, kind: input, shape index: {}]   ;;  %s620_s3 = inlined_call_operand.hbm [shape: f32[1,512], index: 3, kind: input, shape index: {}]   ;;  %s621_s4 = inlined_call_operand.<no memory space> [shape: f32[1,1], index: 4, kind: input, shape index: {}]   ;;  %s622_s5 = inlined_call_operand.vmem [shape: f32[8,1], index: 5, kind: output, shape index: {}]  }
   0x1   :  { %12 = vsyncpa [#allocation6], 0  ;;  %s563_s18 = smov [#allocation5]  }
   0x2   :  { %s28_s19 = sshll.u32 %s563_s18, 4  ;;  %s29_s19 = int_to_ptr.vmem [resolvable:$true] %s28_s19 }
   0x3   :  { %s507_s20 = scalar_lea.vmem %s29_s19, 4096  ;;  %p512_p1 = scmp.lt.s32.totalorder %s29_s19, %s29_s19 }
   0x4   :  { %p508_p0 = scmp.ne.s32.totalorder %s29_s19, %s507_s20  ;;  %p513_p2 = scmp.lt.s32.totalorder %s507_s20, %s507_s20 }
   0x6   :  { %p514_p3 = por %p513_p2, %p512_p1 }
   0x8   :  { %p515_p4 = pnand %p514_p3, %p508_p0 }
   0xa   :  { %518 = shalt.err (!%p515_p4)
}
   0xb   :  { %s564_s21 = smov 256   ;;  %s565_s22 = smov 16  }
   0xc   :  { %34 = dma.hbm_to_vmem [thread:$0]  %s618_s1, 4096, %s29_s19, [#allocation6], %s564_s21, %s564_s21, %s565_s22  }
   0xd   :  { %s566_s25 = smov [#allocation3]   ;;  %s567_s27 = smov [#allocation7]  }
   0xe   :  { %s19_s26 = sshll.u32 %s566_s25, 4  ;;  %s43_s28 = sshll.u32 %s567_s27, 4  ;;  %s20_s26 = int_to_ptr.vmem [resolvable:$true] %s19_s26  ;;  %s44_s28 = int_to_ptr.vmem [resolvable:$true] %s43_s28 }
   0xf   :  { %s527_s29 = scalar_lea.vmem %s20_s26, 64  ;;  %p532_p6 = scmp.lt.s32.totalorder %s20_s26, %s20_s26 }
  0x10   :  { %p528_p5 = scmp.ne.s32.totalorder %s20_s26, %s527_s29  ;;  %p533_p7 = scmp.lt.s32.totalorder %s527_s29, %s527_s29 }
  0x12   :  { %p534_p8 = por %p533_p7, %p532_p6 }
  0x14   :  { %p535_p9 = pnand %p534_p8, %p528_p5 }
  0x16   :  { %538 = shalt.err (!%p535_p9)
}
  0x17   :  { %22 = dma.hbm_to_vmem [thread:$0]  %s617_s0, 64, %s20_s26, [#allocation4]  }
  0x18   :  { %s547_s7 = scalar_lea.vmem %s44_s28, 64  ;;  %p552_p11 = scmp.lt.s32.totalorder %s44_s28, %s44_s28 }
  0x19   :  { %p548_p10 = scmp.ne.s32.totalorder %s44_s28, %s547_s7  ;;  %p553_p12 = scmp.lt.s32.totalorder %s547_s7, %s547_s7 }
  0x1b   :  { %p554_p13 = por %p553_p12, %p552_p11 }
  0x1d   :  { %p555_p0 = pnand %p554_p13, %p548_p10 }
  0x1f   :  { %558 = shalt.err (!%p555_p0)
}
  0x20   :  { %46 = dma.hbm_to_vmem [thread:$0]  %s620_s3, 64, %s44_s28, [#allocation6]  }
  0x21   :  { %559 = dma.done.wait [#allocation4], 64  }
  0x22   :  { %560 = vsyncadd [#allocation4], 4294967232 }
  0x23   :  { %561 = dma.done.wait [#allocation6], 4160  }
  0x24   :  { %562 = vsyncadd [#allocation6], 4294963136  ;;  %v568_v0 = vmov 0   ;;  %v447_v1 = vld [vmem:[#allocation5 + $0xe4] ss:$16 sps:$4 sm:$0xff]   ;;  %v94_v34 = vlaneseq  ;;  %vm400_vm0 = vcmask 7168  }
  0x25   :  { %306 = vmatprep.mubr.bf16.mxu0 %v568_v0  ;;  %347 = vmatprep.mubr.bf16.mxu1 %v568_v0  ;;  %v449_v2 = vld [vmem:[#allocation5 + $0xec] ss:$16 sps:$4 sm:$0xff]   ;;  %v451_v3 = vld [vmem:[#allocation5 + $0xe0] ss:$16 sps:$4 sm:$0xff]   ;;  %v452_v4 = vld [vmem:[#allocation5 + $0xe8] ss:$16 sps:$4 sm:$0xff]  }
  0x26   :  { %274 = vmatprep.subr.bf16.mxu0 %v447_v1  ;;  %315 = vmatprep.subr.bf16.mxu1 %v449_v2  ;;  %v453_v5 = vld [vmem:[#allocation5 + $0xc4] ss:$16 sps:$4 sm:$0xff]   ;;  %v455_v6 = vld [vmem:[#allocation5 + $0xcc] ss:$16 sps:$4 sm:$0xff]   ;;  %v457_v7 = vld [vmem:[#allocation5 + $0xc0] ss:$16 sps:$4 sm:$0xff]  }
  0x27   :  { %275 = vmatpush1.bf16.msra.mxu0 %v451_v3  ;;  %316 = vmatpush1.bf16.msra.mxu1 %v452_v4  ;;  %v458_v8 = vld [vmem:[#allocation5 + $0xc8] ss:$16 sps:$4 sm:$0xff]   ;;  %v459_v9 = vld [vmem:[#allocation5 + $0xa4] ss:$16 sps:$4 sm:$0xff]   ;;  %v461_v10 = vld [vmem:[#allocation5 + $0xac] ss:$16 sps:$4 sm:$0xff]  }
  0x28   :  { %276 = vmatprep.subr.bf16.mxu0 %v453_v5  ;;  %317 = vmatprep.subr.bf16.mxu1 %v455_v6  ;;  %v463_v11 = vld [vmem:[#allocation5 + $0xa0] ss:$16 sps:$4 sm:$0xff]   ;;  %v464_v12 = vld [vmem:[#allocation5 + $0xa8] ss:$16 sps:$4 sm:$0xff]   ;;  %v465_v13 = vld [vmem:[#allocation5 + $0x84] ss:$16 sps:$4 sm:$0xff]  }
  0x29   :  { %v467_v14 = vld [vmem:[#allocation5 + $0x8c] ss:$16 sps:$4 sm:$0xff]   ;;  %v469_v15 = vld [vmem:[#allocation5 + $0x80] ss:$16 sps:$4 sm:$0xff]   ;;  %v470_v16 = vld [vmem:[#allocation5 + $0x88] ss:$16 sps:$4 sm:$0xff]  }
  0x2a   :  { %v471_v17 = vld [vmem:[#allocation5 + $0x64] ss:$16 sps:$4 sm:$0xff]   ;;  %v473_v18 = vld [vmem:[#allocation5 + $0x6c] ss:$16 sps:$4 sm:$0xff]   ;;  %v475_v19 = vld [vmem:[#allocation5 + $0x60] ss:$16 sps:$4 sm:$0xff]  }
  0x2b   :  { %277 = vmatpush1.bf16.msra.mxu0 %v457_v7  ;;  %318 = vmatpush1.bf16.msra.mxu1 %v458_v8  ;;  %v476_v20 = vld [vmem:[#allocation5 + $0x68] ss:$16 sps:$4 sm:$0xff]   ;;  %v477_v21 = vld [vmem:[#allocation5 + $0x44] ss:$16 sps:$4 sm:$0xff]   ;;  %v479_v22 = vld [vmem:[#allocation5 + $0x4c] ss:$16 sps:$4 sm:$0xff]  }
  0x2c   :  { %278 = vmatprep.subr.bf16.mxu0 %v459_v9  ;;  %319 = vmatprep.subr.bf16.mxu1 %v461_v10  ;;  %v481_v23 = vld [vmem:[#allocation5 + $0x40] ss:$16 sps:$4 sm:$0xff]   ;;  %v482_v24 = vld [vmem:[#allocation5 + $0x48] ss:$16 sps:$4 sm:$0xff]   ;;  %v483_v25 = vld [vmem:[#allocation5 + $0x24] ss:$16 sps:$4 sm:$0xff]   ;;  %v392_v9 = vstv %s621_s4 }
  0x2d   :  { %v485_v26 = vld [vmem:[#allocation5 + $0x2c] ss:$16 sps:$4 sm:$0xff]   ;;  %v487_v27 = vld [vmem:[#allocation5 + $0x20] ss:$16 sps:$4 sm:$0xff]   ;;  %v488_v28 = vld [vmem:[#allocation5 + $0x28] ss:$16 sps:$4 sm:$0xff]  }
  0x2e   :  { %v489_v29 = vld [vmem:[#allocation5 + $0x4] ss:$16 sps:$4 sm:$0xff]   ;;  %v491_v30 = vld [vmem:[#allocation5 + $0xc] ss:$16 sps:$4 sm:$0xff]   ;;  %v493_v31 = vld [vmem:[#allocation5] ss:$16 sps:$4 sm:$0xff]  }
  0x2f   :  { %279 = vmatpush1.bf16.msra.mxu0 %v463_v11  ;;  %320 = vmatpush1.bf16.msra.mxu1 %v464_v12  ;;  %v494_v32 = vld [vmem:[#allocation5 + $0x8] ss:$16 sps:$4 sm:$0xff]   ;;  %v59_v33 = vld [vmem:[#allocation3] sm:$0xf]  ;;  %v95_v35 = vshrl.u32 %v94_v34, 7 }
  0x30   :  { %280 = vmatprep.subr.bf16.mxu0 %v465_v13  ;;  %321 = vmatprep.subr.bf16.mxu1 %v467_v14  ;;  %v92_v38 = vld [vmem:[%s619_s2] sm:$0xf]  ;;  %v360_v43 = vld [vmem:[#allocation7] sm:$0xf] }
  0x31   :  { %v96_v36 = vsub.s32 0, %v95_v35  ;;  %v104_v37 = vsub.s32 2, %v95_v35  ;;  %v100_v39 = vsub.s32 1, %v95_v35  ;;  %v108_v40 = vsub.s32 3, %v95_v35 }
  0x33   :  { %281 = vmatpush1.bf16.msra.mxu0 %v469_v15  ;;  %322 = vmatpush1.bf16.msra.mxu1 %v470_v16  ;;  %v97_v41 = vrot.slane %v92_v38, %v96_v36  ;;  %v105_v42 = vrot.slane %v92_v38, %v104_v37  ;;  %v101_v44 = vrot.slane %v92_v38, %v100_v39 }
  0x34   :  { %282 = vmatprep.subr.bf16.mxu0 %v471_v17  ;;  %323 = vmatprep.subr.bf16.mxu1 %v473_v18  ;;  %v109_v45 = vrot.slane %v92_v38, %v108_v40  ;;  %v365_v50 = vrot.slane %v360_v43, %v96_v36  ;;  %v373_v51 = vrot.slane %v360_v43, %v104_v37 }
  0x35   :  { %v369_v53 = vrot.slane %v360_v43, %v100_v39  ;;  %v377_v0 = vrot.slane %v360_v43, %v108_v40 }
  0x37   :  { %283 = vmatpush1.bf16.msra.mxu0 %v475_v19  ;;  %324 = vmatpush1.bf16.msra.mxu1 %v476_v20 }
  0x38   :  { %284 = vmatprep.subr.bf16.mxu0 %v477_v21  ;;  %325 = vmatprep.subr.bf16.mxu1 %v479_v22 }
  0x3b   :  { %285 = vmatpush1.bf16.msra.mxu0 %v481_v23  ;;  %326 = vmatpush1.bf16.msra.mxu1 %v482_v24 }
  0x3c   :  { %286 = vmatprep.subr.bf16.mxu0 %v483_v25  ;;  %327 = vmatprep.subr.bf16.mxu1 %v485_v26 }
  0x3f   :  { %287 = vmatpush1.bf16.msra.mxu0 %v487_v27  ;;  %328 = vmatpush1.bf16.msra.mxu1 %v488_v28 }
  0x40   :  { %288 = vmatprep.subr.bf16.mxu0 %v489_v29  ;;  %329 = vmatprep.subr.bf16.mxu1 %v491_v30 }
  0x43   :  { %289 = vmatpush1.bf16.msra.mxu0 %v493_v31  ;;  %330 = vmatpush1.bf16.msra.mxu1 %v494_v32 }
  0x46   :  { %307 = vmatmul.mubr.bf16.vlgmr.msra.gmra.mxu0 %v59_v33  ;;  %348 = vmatmul.mubr.bf16.vlgmr.msra.gmra.mxu1 %v59_v33 }
 0x106   :  { %v308_v46 = vpop.f32.mrf.mxu0  ;;  %v349_v47 = vpop.f32.mrf.mxu1 }
 0x107   :  { %v309_v48 = vadd.f32 %v308_v46, %v97_v41  ;;  %v350_v49 = vadd.f32 %v349_v47, %v105_v42 }
 0x108   :  { %v310_v52 = vpop.f32.mrf.mxu0  ;;  %v351_v54 = vpop.f32.mrf.mxu1 }
 0x109   :  { %v356_v55 = vmax.f32 %v309_v48, 0.0  ;;  %v358_v56 = vmax.f32 %v350_v49, 0.0  ;;  %v311_v57 = vadd.f32 %v310_v52, %v101_v44  ;;  %v352_v58 = vadd.f32 %v351_v54, %v109_v45 }
 0x10a   :  { %v312_v59 = vpop.f32.mrf.mxu0  ;;  %v353_v60 = vpop.f32.mrf.mxu1 }
 0x10b   :  { %v357_v61 = vmax.f32 %v311_v57, 0.0  ;;  %v382_v1 = vmul.f32 %v365_v50, %v356_v55  ;;  %v384_v2 = vmul.f32 %v373_v51, %v358_v56  ;;  %v359_v4 = vmax.f32 %v352_v58, 0.0 }
 0x10c   :  { %v313_v62 = vpop.f32.mrf.mxu0  ;;  %v354_v63 = vpop.f32.mrf.mxu1 }
 0x10d   :  { %v383_v3 = vmul.f32 %v369_v53, %v357_v61  ;;  %v385_v6 = vmul.f32 %v377_v0, %v359_v4 }
 0x10f   :  { %v386_v5 = vadd.f32 %v383_v3, %v382_v1 }
 0x111   :  { %v387_v7 = vadd.f32 %v386_v5, %v384_v2 }
 0x113   :  { %v388_v8 = vadd.f32 %v387_v7, %v385_v6 }
 0x115   :  { %389 = vadd.xlane.f32.xlu0 %v388_v8 }
 0x19e   :  { %v390_v10 = vpop.xlane.xlu0 %389 }
 0x19f   :  { %v393_v11 = vadd.f32 %v392_v9, %v390_v10 }
 0x1a1   :  { %v440_v12 = vmul.f32 -1.442695, %v393_v11 }
 0x1a3   :  { %495 = vpow2.f32 %v440_v12 }
 0x1b0   :  { %v496_v13 = vpop.eup %495 }
 0x1b1   :  { %v397_v14 = vadd.f32 1.0, %v496_v13 }
 0x1b3   :  { %497 = vrcp.f32 %v397_v14 }
 0x1c0   :  { %v498_v15 = vpop.eup %497 }
 0x1c1   :  { %401 = vst.msk [vmem:[%s622_s5] sm:$0xff] %vm400_vm0, %v498_v15 }
 0x1c2   :  { %406 = vsyncpa [#allocation4], 1 }
 0x1c3   :  { %407 = vsyncpa [#allocation6], 1 }

</bundles_post_ra>
